<compile_context>
chip_gen: v6e
topology: v6e:2x2x1
jax: 0.10.0
libtpu: 0.0.40
codegen_flags: <defaults>
</compile_context>

<pallas_src>
import jax
import jax.numpy as jnp
from jax.experimental import pallas as pl
from jax.experimental.pallas import tpu as pltpu

# ---- module-consistent config ----------------------------------------------------------
BATCH = 2
INPUT_DIM = 32            # PolicyConfig.input_dim
HIDDEN_DIM = 32           # PolicyConfig.hidden_dim
OUTPUT_DIM = 8            # PolicyConfig.output_dim
LEVEL_DIMS = (16, 32, 64)  # PolicyConfig.level_dims (num_hierarchy_levels = 3)
FUSED_DIM = sum(LEVEL_DIMS)                 # 112
NUM_HEAD_COLS = 3 * OUTPUT_DIM + 1          # 3 level heads + value head = 25
FUSED_W_COLS = HIDDEN_DIM + NUM_HEAD_COLS   # fusion-linear (32) + heads (25) = 57
EPS = 1e-5                # nn.LayerNorm default eps

B_PAD = 8                 # pad batch to sublane granularity
OUT_LANES = 256           # packed output slab: two 128-lane tiles

# packed-output lane layout (tile 0: lanes 0..127, tile 1: lanes 128..255)
OFF_L1 = LEVEL_DIMS[0]                     # 16
OFF_L2 = LEVEL_DIMS[0] + LEVEL_DIMS[1]     # 48
O_FUSED = 0                                # [0, 112)   fused features = f0|f1|f2
O_LOGITS = FUSED_DIM                       # [112, 120) fused logits
O_VALUE = O_LOGITS + OUTPUT_DIM            # [120, 121) value
O_LL = 128                                 # [128, 152) level logits (3 x 8)

# bias/gamma/beta slab row indices ([16, 128], each row zero-padded to 128 lanes)
R_B_IN = 0
R_B_L0, R_G_L0, R_BE_L0 = 1, 2, 3
R_B_L1, R_G_L1, R_BE_L1 = 4, 5, 6
R_B_L2, R_G_L2, R_BE_L2 = 7, 8, 9
R_B_FUSED = 10            # concat(b_f1, bo_l0, bo_l1, bo_l2, b_v) -> 57 lanes
R_G_F, R_BE_F = 11, 12
R_B_F2 = 13
VEC_ROWS = 16


# ---- in-kernel helpers ------------------------------------------------------------------
def _layernorm(h, gamma, beta):
    mu = jnp.mean(h, axis=-1, keepdims=True)
    var = jnp.mean((h - mu) ** 2, axis=-1, keepdims=True)
    return (h - mu) * jax.lax.rsqrt(var + EPS) * gamma + beta


# ---- the Pallas kernel: whole forward pass on one VMEM-resident block -------------------
def hierarchical_policy_kernel(x_ref, w_in_ref, w_l0_ref, w_l1_ref, w_l2_ref,
                               w_fused_ref, w_f2_ref, vec_ref, out_ref):
    f32 = jnp.float32

    def vrow(r, n):
        # one [1, n] bias/gamma/beta vector from the packed slab (static slice)
        return vec_ref[r:r + 1, 0:n]

    x = x_ref[...]

    # h = input_projection(x)
    h = jnp.dot(x, w_in_ref[...], preferred_element_type=f32) + vrow(R_B_IN, HIDDEN_DIM)

    # level 0: Linear -> LayerNorm -> ReLU -> Dropout(eval = identity)
    z0 = jnp.dot(h, w_l0_ref[...], preferred_element_type=f32) + vrow(R_B_L0, LEVEL_DIMS[0])
    f0 = jnp.maximum(_layernorm(z0, vrow(R_G_L0, LEVEL_DIMS[0]), vrow(R_BE_L0, LEVEL_DIMS[0])), 0.0)
    # level 1
    z1 = jnp.dot(f0, w_l1_ref[...], preferred_element_type=f32) + vrow(R_B_L1, LEVEL_DIMS[1])
    f1 = jnp.maximum(_layernorm(z1, vrow(R_G_L1, LEVEL_DIMS[1]), vrow(R_BE_L1, LEVEL_DIMS[1])), 0.0)
    # level 2
    z2 = jnp.dot(f1, w_l2_ref[...], preferred_element_type=f32) + vrow(R_B_L2, LEVEL_DIMS[2])
    f2 = jnp.maximum(_layernorm(z2, vrow(R_G_L2, LEVEL_DIMS[2]), vrow(R_BE_L2, LEVEL_DIMS[2])), 0.0)

    # zero-init the packed output block (padding lanes stay 0), then write pieces at
    # static lane offsets — fused features go straight into the slab (no concatenate).
    out_ref[...] = jnp.zeros_like(out_ref)
    out_ref[:, O_FUSED:OFF_L1] = f0
    out_ref[:, OFF_L1:OFF_L2] = f1
    out_ref[:, OFF_L2:FUSED_DIM] = f2
    fused = out_ref[:, 0:FUSED_DIM]

    # ONE matmul on `fused` covers: fusion first linear (cols 0:32),
    # the three level_output heads (cols 32:56) and the value head (col 56).
    r = jnp.dot(fused, w_fused_ref[...], preferred_element_type=f32) + vrow(R_B_FUSED, FUSED_W_COLS)

    # level logits -> tile-1 lanes; value -> lane 120
    out_ref[:, O_LL:O_LL + 3 * OUTPUT_DIM] = r[:, HIDDEN_DIM:HIDDEN_DIM + 3 * OUTPUT_DIM]
    out_ref[:, O_VALUE:O_VALUE + 1] = r[:, FUSED_W_COLS - 1:FUSED_W_COLS]

    # fusion tail: LayerNorm -> ReLU -> Dropout(identity) -> Linear
    fz = jnp.maximum(_layernorm(r[:, 0:HIDDEN_DIM], vrow(R_G_F, HIDDEN_DIM), vrow(R_BE_F, HIDDEN_DIM)), 0.0)
    logits = jnp.dot(fz, w_f2_ref[...], preferred_element_type=f32) + vrow(R_B_F2, OUTPUT_DIM)
    out_ref[:, O_LOGITS:O_LOGITS + OUTPUT_DIM] = logits


# ---- wrapper -----------------------------------------------------------------------------
def _fullspec(shape):
    nd = len(shape)
    return pl.BlockSpec(shape, lambda i, _nd=nd: (0,) * _nd)


def hierarchical_policy_forward(x, packed):
    """packed: (w_in, w_l0, w_l1, w_l2, w_fused, w_f2, vec_slab) from pack_params()."""
    (w_in, w_l0, w_l1, w_l2, w_fused, w_f2, vec) = packed
    B = x.shape[0]
    b_pad = max(B_PAD, -(-B // 8) * 8)
    x_pad = jnp.zeros((b_pad, INPUT_DIM), jnp.float32).at[:B].set(x)

    inputs = [x_pad, w_in, w_l0, w_l1, w_l2, w_fused, w_f2, vec]
    out = pl.pallas_call(
        hierarchical_policy_kernel,
        grid=(1,),
        in_specs=[_fullspec(a.shape) for a in inputs],
        out_specs=_fullspec((b_pad, OUT_LANES)),
        out_shape=jax.ShapeDtypeStruct((b_pad, OUT_LANES), jnp.float32),
        compiler_params=pltpu.CompilerParams(dimension_semantics=("arbitrary",)),
    )(*inputs)

    out = out[:B]
    fused_features = out[:, 0:FUSED_DIM]
    logits = out[:, O_LOGITS:O_LOGITS + OUTPUT_DIM]
    values = out[:, O_VALUE]
    level_logits = [out[:, O_LL + i * OUTPUT_DIM:O_LL + (i + 1) * OUTPUT_DIM] for i in range(3)]
    offs = (0, OFF_L1, OFF_L2, FUSED_DIM)
    level_features = [fused_features[:, offs[i]:offs[i + 1]] for i in range(3)]
    return {
        "logits": logits,
        "values": values,                  # .squeeze(-1)
        "level_logits": level_logits,
        "level_features": level_features,
        "fused_features": fused_features,
    }


# ---- host-side parameter packing ---------------------------------------------------------
def pack_params(params):
    (w_in, b_in,
     w_l0, b_l0, g_l0, be_l0, wo_l0, bo_l0,
     w_l1, b_l1, g_l1, be_l1, wo_l1, bo_l1,
     w_l2, b_l2, g_l2, be_l2, wo_l2, bo_l2,
     w_f1, b_f1, g_f, be_f, w_f2, b_f2,
     w_v, b_v) = params
    f32 = jnp.float32

    # Block-structured head weight: level_output heads act on their slice of `fused`,
    # value head acts on all of `fused`.
    w_heads = jnp.zeros((FUSED_DIM, NUM_HEAD_COLS), f32)
    off = 0
    col = 0
    for ld, wo in zip(LEVEL_DIMS, (wo_l0, wo_l1, wo_l2)):
        w_heads = w_heads.at[off:off + ld, col:col + OUTPUT_DIM].set(wo)
        off += ld
        col += OUTPUT_DIM
    w_heads = w_heads.at[:, col:col + 1].set(w_v)

    w_fused = jnp.concatenate([w_f1, w_heads], axis=1)                       # [112, 57]
    b_fused = jnp.concatenate([b_f1, bo_l0, bo_l1, bo_l2, b_v], axis=1)      # [1, 57]

    def row(v):
        return jnp.pad(v, ((0, 0), (0, 128 - v.shape[1])))

    rows = [b_in,
            b_l0, g_l0, be_l0,
            b_l1, g_l1, be_l1,
            b_l2, g_l2, be_l2,
            b_fused, g_f, be_f, b_f2]
    vec = jnp.concatenate([row(v) for v in rows] +
                          [jnp.zeros((VEC_ROWS - len(rows), 128), f32)], axis=0)  # [16, 128]

    return (w_in, w_l0, w_l1, w_l2, w_fused, w_f2, vec)


# ---- deterministic parameter construction (raw, PyTorch-style layout) --------------------
def init_params(key):
    f32 = jnp.float32

    def linear_params(key, fan_in, fan_out):
        kw, kb = jax.random.split(key)
        bound = 1.0 / jnp.sqrt(fan_in)
        w = jax.random.uniform(kw, (fan_in, fan_out), f32, -bound, bound)
        b = jax.random.uniform(kb, (1, fan_out), f32, -bound, bound)
        return w, b

    keys = jax.random.split(key, 16)
    params = []

    w_in, b_in = linear_params(keys[0], INPUT_DIM, HIDDEN_DIM)
    params += [w_in, b_in]

    prev = HIDDEN_DIM
    for i, ld in enumerate(LEVEL_DIMS):
        w_l, b_l = linear_params(keys[1 + 2 * i], prev, ld)
        gamma = jnp.ones((1, ld), f32)
        beta = jnp.zeros((1, ld), f32)
        w_o, b_o = linear_params(keys[2 + 2 * i], ld, OUTPUT_DIM)
        params += [w_l, b_l, gamma, beta, w_o, b_o]
        prev = ld

    w_f1, b_f1 = linear_params(keys[8], FUSED_DIM, HIDDEN_DIM)
    g_f = jnp.ones((1, HIDDEN_DIM), f32)
    be_f = jnp.zeros((1, HIDDEN_DIM), f32)
    w_f2, b_f2 = linear_params(keys[9], HIDDEN_DIM, OUTPUT_DIM)
    params += [w_f1, b_f1, g_f, be_f, w_f2, b_f2]

    w_v, b_v = linear_params(keys[10], FUSED_DIM, 1)
    params += [w_v, b_v]

    return params


# ---- pure-JAX reference for a sanity check -----------------------------------------------
def reference_forward(x, params):
    (w_in, b_in,
     w_l0, b_l0, g_l0, be_l0, wo_l0, bo_l0,
     w_l1, b_l1, g_l1, be_l1, wo_l1, bo_l1,
     w_l2, b_l2, g_l2, be_l2, wo_l2, bo_l2,
     w_f1, b_f1, g_f, be_f, w_f2, b_f2,
     w_v, b_v) = params

    def lin(h, w, b):
        return jnp.dot(h, w, preferred_element_type=jnp.float32) + b

    def ln(h, g, b):
        mu = jnp.mean(h, axis=-1, keepdims=True)
        var = jnp.mean((h - mu) ** 2, axis=-1, keepdims=True)
        return (h - mu) * jax.lax.rsqrt(var + EPS) * g + b

    h = lin(x, w_in, b_in)
    f0 = jnp.maximum(ln(lin(h, w_l0, b_l0), g_l0, be_l0), 0.0)
    f1 = jnp.maximum(ln(lin(f0, w_l1, b_l1), g_l1, be_l1), 0.0)
    f2 = jnp.maximum(ln(lin(f1, w_l2, b_l2), g_l2, be_l2), 0.0)
    fused = jnp.concatenate([f0, f1, f2], axis=-1)
    fz = jnp.maximum(ln(lin(fused, w_f1, b_f1), g_f, be_f), 0.0)
    logits = lin(fz, w_f2, b_f2)
    values = lin(fused, w_v, b_v)[:, 0]
    level_logits = [lin(f0, wo_l0, bo_l0), lin(f1, wo_l1, bo_l1), lin(f2, wo_l2, bo_l2)]
    level_features = [f0, f1, f2]
    return logits, values, level_logits, level_features, fused


# ---- main --------------------------------------------------------------------------------
if __name__ == "__main__":
    key = jax.random.PRNGKey(0)
    kx, kp = jax.random.split(key)

    x = jax.random.normal(kx, (BATCH, INPUT_DIM), jnp.float32)
    params = init_params(kp)
    packed = pack_params(params)

    out = hierarchical_policy_forward(x, packed)
    jax.block_until_ready(out)

    # shape checks
    assert out["logits"].shape == (BATCH, OUTPUT_DIM)
    assert out["values"].shape == (BATCH,)
    assert out["fused_features"].shape == (BATCH, FUSED_DIM)
    assert [f.shape for f in out["level_features"]] == [(BATCH, d) for d in LEVEL_DIMS]
    assert [l.shape for l in out["level_logits"]] == [(BATCH, OUTPUT_DIM)] * 3

    # numerical checks against the pure-JAX reference
    ref_logits, ref_values, ref_ll, ref_lf, ref_fused = reference_forward(x, params)
    assert jnp.allclose(out["logits"], ref_logits, rtol=2e-2, atol=2e-2)
    assert jnp.allclose(out["values"], ref_values, rtol=2e-2, atol=2e-2)
    assert jnp.allclose(out["fused_features"], ref_fused, rtol=2e-2, atol=2e-2)
    for a, b in zip(out["level_logits"], ref_ll):
        assert jnp.allclose(a, b, rtol=2e-2, atol=2e-2)
    for a, b in zip(out["level_features"], ref_lf):
        assert jnp.allclose(a, b, rtol=2e-2, atol=2e-2)

    print("KERNEL_OK")
</pallas_src>

<mosaic_0001>
module attributes {stable_mosaic.version = 11 : i64} {
  func.func @hierarchical_policy_kernel(%arg0: i32, %arg1: memref<8x32xf32, #tpu.memory_space<vmem>>, %arg2: memref<32x32xf32, #tpu.memory_space<vmem>>, %arg3: memref<32x16xf32, #tpu.memory_space<vmem>>, %arg4: memref<16x32xf32, #tpu.memory_space<vmem>>, %arg5: memref<32x64xf32, #tpu.memory_space<vmem>>, %arg6: memref<112x57xf32, #tpu.memory_space<vmem>>, %arg7: memref<32x8xf32, #tpu.memory_space<vmem>>, %arg8: memref<16x128xf32, #tpu.memory_space<vmem>>, %arg9: memref<8x256xf32, #tpu.memory_space<vmem>>) attributes {dimension_semantics = [#tpu.dimension_semantics<arbitrary>], iteration_bounds = array<i64: 1>, scalar_prefetch = 0 : i64, scratch_operands = 0 : i64, tpu.core_type = #tpu.core_type<tc>, window_params = [{pipeline_mode = #tpu.pipeline_mode<synchronous>, transform_indices = @transform_0, window_bounds = array<i64: 8, 32>}, {pipeline_mode = #tpu.pipeline_mode<synchronous>, transform_indices = @transform_1, window_bounds = array<i64: 32, 32>}, {pipeline_mode = #tpu.pipeline_mode<synchronous>, transform_indices = @transform_2, window_bounds = array<i64: 32, 16>}, {pipeline_mode = #tpu.pipeline_mode<synchronous>, transform_indices = @transform_3, window_bounds = array<i64: 16, 32>}, {pipeline_mode = #tpu.pipeline_mode<synchronous>, transform_indices = @transform_4, window_bounds = array<i64: 32, 64>}, {pipeline_mode = #tpu.pipeline_mode<synchronous>, transform_indices = @transform_5, window_bounds = array<i64: 112, 57>}, {pipeline_mode = #tpu.pipeline_mode<synchronous>, transform_indices = @transform_6, window_bounds = array<i64: 32, 8>}, {pipeline_mode = #tpu.pipeline_mode<synchronous>, transform_indices = @transform_7, window_bounds = array<i64: 16, 128>}, {pipeline_mode = #tpu.pipeline_mode<synchronous>, transform_indices = @transform_8, window_bounds = array<i64: 8, 256>}]} {
    %c0 = arith.constant 0 : index
    %c0_0 = arith.constant 0 : index
    %0 = vector.load %arg1[%c0, %c0_0] : memref<8x32xf32, #tpu.memory_space<vmem>>, vector<8x32xf32>
    %c0_1 = arith.constant 0 : index
    %c0_2 = arith.constant 0 : index
    %1 = vector.load %arg2[%c0_1, %c0_2] : memref<32x32xf32, #tpu.memory_space<vmem>>, vector<32x32xf32>
    %cst = arith.constant dense<0.000000e+00> : vector<8x32xf32>
    %2 = tpu.matmul %0, %1, %cst {dimension_numbers = #tpu.dot_dimension_numbers<[1], [0], [0], [1], [0, 0, 1, 1], [], []>} : vector<8x32xf32>, vector<32x32xf32>, vector<8x32xf32> -> vector<8x32xf32>
    %c0_3 = arith.constant 0 : index
    %c0_4 = arith.constant 0 : index
    %3 = vector.load %arg8[%c0_3, %c0_4] : memref<16x128xf32, #tpu.memory_space<vmem>>, vector<1x32xf32>
    %4 = vector.broadcast %3 : vector<1x32xf32> to vector<8x32xf32>
    %5 = arith.addf %2, %4 : vector<8x32xf32>
    %c0_5 = arith.constant 0 : index
    %c0_6 = arith.constant 0 : index
    %6 = vector.load %arg3[%c0_5, %c0_6] : memref<32x16xf32, #tpu.memory_space<vmem>>, vector<32x16xf32>
    %cst_7 = arith.constant dense<0.000000e+00> : vector<8x16xf32>
    %7 = tpu.matmul %5, %6, %cst_7 {dimension_numbers = #tpu.dot_dimension_numbers<[1], [0], [0], [1], [0, 0, 1, 1], [], []>} : vector<8x32xf32>, vector<32x16xf32>, vector<8x16xf32> -> vector<8x16xf32>
    %c1 = arith.constant 1 : index
    %c0_8 = arith.constant 0 : index
    %8 = vector.load %arg8[%c1, %c0_8] : memref<16x128xf32, #tpu.memory_space<vmem>>, vector<1x16xf32>
    %9 = vector.broadcast %8 : vector<1x16xf32> to vector<8x16xf32>
    %10 = arith.addf %7, %9 : vector<8x16xf32>
    %c2 = arith.constant 2 : index
    %c0_9 = arith.constant 0 : index
    %11 = vector.load %arg8[%c2, %c0_9] : memref<16x128xf32, #tpu.memory_space<vmem>>, vector<1x16xf32>
    %c3 = arith.constant 3 : index
    %c0_10 = arith.constant 0 : index
    %12 = vector.load %arg8[%c3, %c0_10] : memref<16x128xf32, #tpu.memory_space<vmem>>, vector<1x16xf32>
    %cst_11 = arith.constant dense<0.000000e+00> : vector<8xf32>
    %13 = vector.multi_reduction <add>, %10, %cst_11 [1] : vector<8x16xf32> to vector<8xf32>
    %14 = vector.shape_cast %13 : vector<8xf32> to vector<8x1xf32>
    %cst_12 = arith.constant 1.600000e+01 : f32
    %15 = vector.broadcast %cst_12 : f32 to vector<8x1xf32>
    %16 = arith.divf %14, %15 : vector<8x1xf32>
    %17 = vector.broadcast %16 : vector<8x1xf32> to vector<8x16xf32>
    %18 = arith.subf %10, %17 : vector<8x16xf32>
    %19 = arith.mulf %18, %18 : vector<8x16xf32>
    %cst_13 = arith.constant dense<0.000000e+00> : vector<8xf32>
    %20 = vector.multi_reduction <add>, %19, %cst_13 [1] : vector<8x16xf32> to vector<8xf32>
    %21 = vector.shape_cast %20 : vector<8xf32> to vector<8x1xf32>
    %cst_14 = arith.constant 1.600000e+01 : f32
    %22 = vector.broadcast %cst_14 : f32 to vector<8x1xf32>
    %23 = arith.divf %21, %22 : vector<8x1xf32>
    %24 = vector.broadcast %16 : vector<8x1xf32> to vector<8x16xf32>
    %25 = arith.subf %10, %24 : vector<8x16xf32>
    %cst_15 = arith.constant 9.99999974E-6 : f32
    %26 = vector.broadcast %cst_15 : f32 to vector<8x1xf32>
    %27 = arith.addf %23, %26 : vector<8x1xf32>
    %28 = math.rsqrt %27 : vector<8x1xf32>
    %29 = vector.broadcast %28 : vector<8x1xf32> to vector<8x16xf32>
    %30 = arith.mulf %25, %29 : vector<8x16xf32>
    %31 = vector.broadcast %11 : vector<1x16xf32> to vector<8x16xf32>
    %32 = arith.mulf %30, %31 : vector<8x16xf32>
    %33 = vector.broadcast %12 : vector<1x16xf32> to vector<8x16xf32>
    %34 = arith.addf %32, %33 : vector<8x16xf32>
    %cst_16 = arith.constant 0.000000e+00 : f32
    %35 = vector.broadcast %cst_16 : f32 to vector<8x16xf32>
    %36 = arith.maximumf %34, %35 : vector<8x16xf32>
    %c0_17 = arith.constant 0 : index
    %c0_18 = arith.constant 0 : index
    %37 = vector.load %arg4[%c0_17, %c0_18] : memref<16x32xf32, #tpu.memory_space<vmem>>, vector<16x32xf32>
    %cst_19 = arith.constant dense<0.000000e+00> : vector<8x32xf32>
    %38 = tpu.matmul %36, %37, %cst_19 {dimension_numbers = #tpu.dot_dimension_numbers<[1], [0], [0], [1], [0, 0, 1, 1], [], []>} : vector<8x16xf32>, vector<16x32xf32>, vector<8x32xf32> -> vector<8x32xf32>
    %c4 = arith.constant 4 : index
    %c0_20 = arith.constant 0 : index
    %39 = vector.load %arg8[%c4, %c0_20] : memref<16x128xf32, #tpu.memory_space<vmem>>, vector<1x32xf32>
    %40 = vector.broadcast %39 : vector<1x32xf32> to vector<8x32xf32>
    %41 = arith.addf %38, %40 : vector<8x32xf32>
    %c5 = arith.constant 5 : index
    %c0_21 = arith.constant 0 : index
    %42 = vector.load %arg8[%c5, %c0_21] : memref<16x128xf32, #tpu.memory_space<vmem>>, vector<1x32xf32>
    %c6 = arith.constant 6 : index
    %c0_22 = arith.constant 0 : index
    %43 = vector.load %arg8[%c6, %c0_22] : memref<16x128xf32, #tpu.memory_space<vmem>>, vector<1x32xf32>
    %cst_23 = arith.constant dense<0.000000e+00> : vector<8xf32>
    %44 = vector.multi_reduction <add>, %41, %cst_23 [1] : vector<8x32xf32> to vector<8xf32>
    %45 = vector.shape_cast %44 : vector<8xf32> to vector<8x1xf32>
    %cst_24 = arith.constant 3.200000e+01 : f32
    %46 = vector.broadcast %cst_24 : f32 to vector<8x1xf32>
    %47 = arith.divf %45, %46 : vector<8x1xf32>
    %48 = vector.broadcast %47 : vector<8x1xf32> to vector<8x32xf32>
    %49 = arith.subf %41, %48 : vector<8x32xf32>
    %50 = arith.mulf %49, %49 : vector<8x32xf32>
    %cst_25 = arith.constant dense<0.000000e+00> : vector<8xf32>
    %51 = vector.multi_reduction <add>, %50, %cst_25 [1] : vector<8x32xf32> to vector<8xf32>
    %52 = vector.shape_cast %51 : vector<8xf32> to vector<8x1xf32>
    %cst_26 = arith.constant 3.200000e+01 : f32
    %53 = vector.broadcast %cst_26 : f32 to vector<8x1xf32>
    %54 = arith.divf %52, %53 : vector<8x1xf32>
    %55 = vector.broadcast %47 : vector<8x1xf32> to vector<8x32xf32>
    %56 = arith.subf %41, %55 : vector<8x32xf32>
    %cst_27 = arith.constant 9.99999974E-6 : f32
    %57 = vector.broadcast %cst_27 : f32 to vector<8x1xf32>
    %58 = arith.addf %54, %57 : vector<8x1xf32>
    %59 = math.rsqrt %58 : vector<8x1xf32>
    %60 = vector.broadcast %59 : vector<8x1xf32> to vector<8x32xf32>
    %61 = arith.mulf %56, %60 : vector<8x32xf32>
    %62 = vector.broadcast %42 : vector<1x32xf32> to vector<8x32xf32>
    %63 = arith.mulf %61, %62 : vector<8x32xf32>
    %64 = vector.broadcast %43 : vector<1x32xf32> to vector<8x32xf32>
    %65 = arith.addf %63, %64 : vector<8x32xf32>
    %cst_28 = arith.constant 0.000000e+00 : f32
    %66 = vector.broadcast %cst_28 : f32 to vector<8x32xf32>
    %67 = arith.maximumf %65, %66 : vector<8x32xf32>
    %c0_29 = arith.constant 0 : index
    %c0_30 = arith.constant 0 : index
    %68 = vector.load %arg5[%c0_29, %c0_30] : memref<32x64xf32, #tpu.memory_space<vmem>>, vector<32x64xf32>
    %cst_31 = arith.constant dense<0.000000e+00> : vector<8x64xf32>
    %69 = tpu.matmul %67, %68, %cst_31 {dimension_numbers = #tpu.dot_dimension_numbers<[1], [0], [0], [1], [0, 0, 1, 1], [], []>} : vector<8x32xf32>, vector<32x64xf32>, vector<8x64xf32> -> vector<8x64xf32>
    %c7 = arith.constant 7 : index
    %c0_32 = arith.constant 0 : index
    %70 = vector.load %arg8[%c7, %c0_32] : memref<16x128xf32, #tpu.memory_space<vmem>>, vector<1x64xf32>
    %71 = vector.broadcast %70 : vector<1x64xf32> to vector<8x64xf32>
    %72 = arith.addf %69, %71 : vector<8x64xf32>
    %c8 = arith.constant 8 : index
    %c0_33 = arith.constant 0 : index
    %73 = vector.load %arg8[%c8, %c0_33] : memref<16x128xf32, #tpu.memory_space<vmem>>, vector<1x64xf32>
    %c9 = arith.constant 9 : index
    %c0_34 = arith.constant 0 : index
    %74 = vector.load %arg8[%c9, %c0_34] : memref<16x128xf32, #tpu.memory_space<vmem>>, vector<1x64xf32>
    %cst_35 = arith.constant dense<0.000000e+00> : vector<8xf32>
    %75 = vector.multi_reduction <add>, %72, %cst_35 [1] : vector<8x64xf32> to vector<8xf32>
    %76 = vector.shape_cast %75 : vector<8xf32> to vector<8x1xf32>
    %cst_36 = arith.constant 6.400000e+01 : f32
    %77 = vector.broadcast %cst_36 : f32 to vector<8x1xf32>
    %78 = arith.divf %76, %77 : vector<8x1xf32>
    %79 = vector.broadcast %78 : vector<8x1xf32> to vector<8x64xf32>
    %80 = arith.subf %72, %79 : vector<8x64xf32>
    %81 = arith.mulf %80, %80 : vector<8x64xf32>
    %cst_37 = arith.constant dense<0.000000e+00> : vector<8xf32>
    %82 = vector.multi_reduction <add>, %81, %cst_37 [1] : vector<8x64xf32> to vector<8xf32>
    %83 = vector.shape_cast %82 : vector<8xf32> to vector<8x1xf32>
    %cst_38 = arith.constant 6.400000e+01 : f32
    %84 = vector.broadcast %cst_38 : f32 to vector<8x1xf32>
    %85 = arith.divf %83, %84 : vector<8x1xf32>
    %86 = vector.broadcast %78 : vector<8x1xf32> to vector<8x64xf32>
    %87 = arith.subf %72, %86 : vector<8x64xf32>
    %cst_39 = arith.constant 9.99999974E-6 : f32
    %88 = vector.broadcast %cst_39 : f32 to vector<8x1xf32>
    %89 = arith.addf %85, %88 : vector<8x1xf32>
    %90 = math.rsqrt %89 : vector<8x1xf32>
    %91 = vector.broadcast %90 : vector<8x1xf32> to vector<8x64xf32>
    %92 = arith.mulf %87, %91 : vector<8x64xf32>
    %93 = vector.broadcast %73 : vector<1x64xf32> to vector<8x64xf32>
    %94 = arith.mulf %92, %93 : vector<8x64xf32>
    %95 = vector.broadcast %74 : vector<1x64xf32> to vector<8x64xf32>
    %96 = arith.addf %94, %95 : vector<8x64xf32>
    %cst_40 = arith.constant 0.000000e+00 : f32
    %97 = vector.broadcast %cst_40 : f32 to vector<8x64xf32>
    %98 = arith.maximumf %96, %97 : vector<8x64xf32>
    %cst_41 = arith.constant 0.000000e+00 : f32
    %99 = vector.broadcast %cst_41 : f32 to vector<8x256xf32>
    %c0_42 = arith.constant 0 : index
    %c0_43 = arith.constant 0 : index
    %100 = vector.load %arg9[%c0_42, %c0_43] : memref<8x256xf32, #tpu.memory_space<vmem>>, vector<8x256xf32>
    tpu.vector_store %arg9[%c0_42, %c0_43], %99 {strides = array<i32>} : memref<8x256xf32, #tpu.memory_space<vmem>>, vector<8x256xf32>,
    %c0_44 = arith.constant 0 : index
    %c0_45 = arith.constant 0 : index
    %101 = vector.load %arg9[%c0_44, %c0_45] : memref<8x256xf32, #tpu.memory_space<vmem>>, vector<8x16xf32>
    tpu.vector_store %arg9[%c0_44, %c0_45], %36 {strides = array<i32>} : memref<8x256xf32, #tpu.memory_space<vmem>>, vector<8x16xf32>,
    %c0_46 = arith.constant 0 : index
    %c16 = arith.constant 16 : index
    %102 = vector.load %arg9[%c0_46, %c16] : memref<8x256xf32, #tpu.memory_space<vmem>>, vector<8x32xf32>
    tpu.vector_store %arg9[%c0_46, %c16], %67 {strides = array<i32>} : memref<8x256xf32, #tpu.memory_space<vmem>>, vector<8x32xf32>,
    %c0_47 = arith.constant 0 : index
    %c48 = arith.constant 48 : index
    %103 = vector.load %arg9[%c0_47, %c48] : memref<8x256xf32, #tpu.memory_space<vmem>>, vector<8x64xf32>
    tpu.vector_store %arg9[%c0_47, %c48], %98 {strides = array<i32>} : memref<8x256xf32, #tpu.memory_space<vmem>>, vector<8x64xf32>,
    %c0_48 = arith.constant 0 : index
    %c0_49 = arith.constant 0 : index
    %104 = vector.load %arg9[%c0_48, %c0_49] : memref<8x256xf32, #tpu.memory_space<vmem>>, vector<8x112xf32>
    %c0_50 = arith.constant 0 : index
    %c0_51 = arith.constant 0 : index
    %105 = vector.load %arg6[%c0_50, %c0_51] : memref<112x57xf32, #tpu.memory_space<vmem>>, vector<112x57xf32>
    %cst_52 = arith.constant dense<0.000000e+00> : vector<8x57xf32>
    %106 = tpu.matmul %104, %105, %cst_52 {dimension_numbers = #tpu.dot_dimension_numbers<[1], [0], [0], [1], [0, 0, 1, 1], [], []>} : vector<8x112xf32>, vector<112x57xf32>, vector<8x57xf32> -> vector<8x57xf32>
    %c10 = arith.constant 10 : index
    %c0_53 = arith.constant 0 : index
    %107 = vector.load %arg8[%c10, %c0_53] : memref<16x128xf32, #tpu.memory_space<vmem>>, vector<1x57xf32>
    %108 = vector.broadcast %107 : vector<1x57xf32> to vector<8x57xf32>
    %109 = arith.addf %106, %108 : vector<8x57xf32>
    %110 = vector.extract_strided_slice %109 {offsets = [0, 32], sizes = [8, 24], strides = [1, 1]} : vector<8x57xf32> to vector<8x24xf32>
    %c0_54 = arith.constant 0 : index
    %c128 = arith.constant 128 : index
    %111 = vector.load %arg9[%c0_54, %c128] : memref<8x256xf32, #tpu.memory_space<vmem>>, vector<8x24xf32>
    tpu.vector_store %arg9[%c0_54, %c128], %110 {strides = array<i32>} : memref<8x256xf32, #tpu.memory_space<vmem>>, vector<8x24xf32>,
    %112 = vector.extract_strided_slice %109 {offsets = [0, 56], sizes = [8, 1], strides = [1, 1]} : vector<8x57xf32> to vector<8x1xf32>
    %c0_55 = arith.constant 0 : index
    %c120 = arith.constant 120 : index
    %113 = vector.load %arg9[%c0_55, %c120] : memref<8x256xf32, #tpu.memory_space<vmem>>, vector<8x1xf32>
    tpu.vector_store %arg9[%c0_55, %c120], %112 {strides = array<i32>} : memref<8x256xf32, #tpu.memory_space<vmem>>, vector<8x1xf32>,
    %114 = vector.extract_strided_slice %109 {offsets = [0, 0], sizes = [8, 32], strides = [1, 1]} : vector<8x57xf32> to vector<8x32xf32>
    %c11 = arith.constant 11 : index
    %c0_56 = arith.constant 0 : index
    %115 = vector.load %arg8[%c11, %c0_56] : memref<16x128xf32, #tpu.memory_space<vmem>>, vector<1x32xf32>
    %c12 = arith.constant 12 : index
    %c0_57 = arith.constant 0 : index
    %116 = vector.load %arg8[%c12, %c0_57] : memref<16x128xf32, #tpu.memory_space<vmem>>, vector<1x32xf32>
    %cst_58 = arith.constant dense<0.000000e+00> : vector<8xf32>
    %117 = vector.multi_reduction <add>, %114, %cst_58 [1] : vector<8x32xf32> to vector<8xf32>
    %118 = vector.shape_cast %117 : vector<8xf32> to vector<8x1xf32>
    %cst_59 = arith.constant 3.200000e+01 : f32
    %119 = vector.broadcast %cst_59 : f32 to vector<8x1xf32>
    %120 = arith.divf %118, %119 : vector<8x1xf32>
    %121 = vector.broadcast %120 : vector<8x1xf32> to vector<8x32xf32>
    %122 = arith.subf %114, %121 : vector<8x32xf32>
    %123 = arith.mulf %122, %122 : vector<8x32xf32>
    %cst_60 = arith.constant dense<0.000000e+00> : vector<8xf32>
    %124 = vector.multi_reduction <add>, %123, %cst_60 [1] : vector<8x32xf32> to vector<8xf32>
    %125 = vector.shape_cast %124 : vector<8xf32> to vector<8x1xf32>
    %cst_61 = arith.constant 3.200000e+01 : f32
    %126 = vector.broadcast %cst_61 : f32 to vector<8x1xf32>
    %127 = arith.divf %125, %126 : vector<8x1xf32>
    %128 = vector.broadcast %120 : vector<8x1xf32> to vector<8x32xf32>
    %129 = arith.subf %114, %128 : vector<8x32xf32>
    %cst_62 = arith.constant 9.99999974E-6 : f32
    %130 = vector.broadcast %cst_62 : f32 to vector<8x1xf32>
    %131 = arith.addf %127, %130 : vector<8x1xf32>
    %132 = math.rsqrt %131 : vector<8x1xf32>
    %133 = vector.broadcast %132 : vector<8x1xf32> to vector<8x32xf32>
    %134 = arith.mulf %129, %133 : vector<8x32xf32>
    %135 = vector.broadcast %115 : vector<1x32xf32> to vector<8x32xf32>
    %136 = arith.mulf %134, %135 : vector<8x32xf32>
    %137 = vector.broadcast %116 : vector<1x32xf32> to vector<8x32xf32>
    %138 = arith.addf %136, %137 : vector<8x32xf32>
    %cst_63 = arith.constant 0.000000e+00 : f32
    %139 = vector.broadcast %cst_63 : f32 to vector<8x32xf32>
    %140 = arith.maximumf %138, %139 : vector<8x32xf32>
    %c0_64 = arith.constant 0 : index
    %c0_65 = arith.constant 0 : index
    %141 = vector.load %arg7[%c0_64, %c0_65] : memref<32x8xf32, #tpu.memory_space<vmem>>, vector<32x8xf32>
    %cst_66 = arith.constant dense<0.000000e+00> : vector<8x8xf32>
    %142 = tpu.matmul %140, %141, %cst_66 {dimension_numbers = #tpu.dot_dimension_numbers<[1], [0], [0], [1], [0, 0, 1, 1], [], []>} : vector<8x32xf32>, vector<32x8xf32>, vector<8x8xf32> -> vector<8x8xf32>
    %c13 = arith.constant 13 : index
    %c0_67 = arith.constant 0 : index
    %143 = vector.load %arg8[%c13, %c0_67] : memref<16x128xf32, #tpu.memory_space<vmem>>, vector<1x8xf32>
    %144 = vector.broadcast %143 : vector<1x8xf32> to vector<8x8xf32>
    %145 = arith.addf %142, %144 : vector<8x8xf32>
    %c0_68 = arith.constant 0 : index
    %c112 = arith.constant 112 : index
    %146 = vector.load %arg9[%c0_68, %c112] : memref<8x256xf32, #tpu.memory_space<vmem>>, vector<8x8xf32>
    tpu.vector_store %arg9[%c0_68, %c112], %145 {strides = array<i32>} : memref<8x256xf32, #tpu.memory_space<vmem>>, vector<8x8xf32>,
    return
  }
  func.func @transform_0(%arg0: i32) -> (i32, i32) {
    %c0_i32 = arith.constant 0 : i32
    %c0_i32_0 = arith.constant 0 : i32
    %c0_i32_1 = arith.constant 0 : i32
    return %c0_i32, %c0_i32_0 : i32, i32
  }
  func.func @transform_1(%arg0: i32) -> (i32, i32) {
    %c0_i32 = arith.constant 0 : i32
    %c0_i32_0 = arith.constant 0 : i32
    %c0_i32_1 = arith.constant 0 : i32
    return %c0_i32, %c0_i32_0 : i32, i32
  }
  func.func @transform_2(%arg0: i32) -> (i32, i32) {
    %c0_i32 = arith.constant 0 : i32
    %c0_i32_0 = arith.constant 0 : i32
    %c0_i32_1 = arith.constant 0 : i32
    return %c0_i32, %c0_i32_0 : i32, i32
  }
  func.func @transform_3(%arg0: i32) -> (i32, i32) {
    %c0_i32 = arith.constant 0 : i32
    %c0_i32_0 = arith.constant 0 : i32
    %c0_i32_1 = arith.constant 0 : i32
    return %c0_i32, %c0_i32_0 : i32, i32
  }
  func.func @transform_4(%arg0: i32) -> (i32, i32) {
    %c0_i32 = arith.constant 0 : i32
    %c0_i32_0 = arith.constant 0 : i32
    %c0_i32_1 = arith.constant 0 : i32
    return %c0_i32, %c0_i32_0 : i32, i32
  }
  func.func @transform_5(%arg0: i32) -> (i32, i32) {
    %c0_i32 = arith.constant 0 : i32
    %c0_i32_0 = arith.constant 0 : i32
    %c0_i32_1 = arith.constant 0 : i32
    return %c0_i32, %c0_i32_0 : i32, i32
  }
  func.func @transform_6(%arg0: i32) -> (i32, i32) {
    %c0_i32 = arith.constant 0 : i32
    %c0_i32_0 = arith.constant 0 : i32
    %c0_i32_1 = arith.constant 0 : i32
    return %c0_i32, %c0_i32_0 : i32, i32
  }
  func.func @transform_7(%arg0: i32) -> (i32, i32) {
    %c0_i32 = arith.constant 0 : i32
    %c0_i32_0 = arith.constant 0 : i32
    %c0_i32_1 = arith.constant 0 : i32
    return %c0_i32, %c0_i32_0 : i32, i32
  }
  func.func @transform_8(%arg0: i32) -> (i32, i32) {
    %c0_i32 = arith.constant 0 : i32
    %c0_i32_0 = arith.constant 0 : i32
    %c0_i32_1 = arith.constant 0 : i32
    return %c0_i32, %c0_i32_0 : i32, i32
  }
}

</mosaic_0001>

<bundles_post_ra>
// kernel: tpu_custom_call.1
= control target key start
LH: loop header
LB: loop body
LE: loop exit
PB: predicated region body
PF: predicated region fallthrough
CT: control target
= control target key end

     0   :  { %v866_v1 = vmov 0.0   ;;  %vm867_vm0 = vmmov 0   ;;  %s1121_s0 = inlined_call_operand.vmem [shape: f32[8,32], index: 0, kind: input, shape index: {}]   ;;  %s1122_s1 = inlined_call_operand.vmem [shape: f32[32,32], index: 1, kind: input, shape index: {}]   ;;  %s1123_s2 = inlined_call_operand.vmem [shape: f32[32,16], index: 2, kind: input, shape index: {}]   ;;  %s1124_s3 = inlined_call_operand.vmem [shape: f32[16,32], index: 3, kind: input, shape index: {}]   ;;  %s1125_s4 = inlined_call_operand.vmem [shape: f32[32,64], index: 4, kind: input, shape index: {}]   ;;  %s1126_s5 = inlined_call_operand.vmem [shape: f32[112,57], index: 5, kind: input, shape index: {}]   ;;  %s1127_s6 = inlined_call_operand.vmem [shape: f32[32,8], index: 6, kind: input, shape index: {}]   ;;  %s1128_s7 = inlined_call_operand.vmem [shape: f32[16,128], index: 7, kind: input, shape index: {}]   ;;  %s1129_s8 = inlined_call_operand.hbm [shape: f32[8,256], index: 8, kind: output, shape index: {}]  }
   0x1   :  { %v34_v0 = vld [vmem:[%s1122_s1 + $0x18] sm:$0xff]  ;;  %746 = vmatprep.subr.mxu1 %v866_v1  ;;  %441 = vst [vmem:[#allocation2] sm:$0xff] %v866_v1  ;;  %442 = vst [vmem:[#allocation2 + $0x8] sm:$0xff] %v866_v1  ;;  %v33_v2 = vld [vmem:[%s1122_s1 + $0x10] sm:$0xff]  ;;  %754 = vmatprep.mubr.msk.f32.mxu1 %vm867_vm0, %v866_v1 }
   0x2   :  { %747 = vmatpush3.msra.mxu1 %v34_v0  ;;  %768 = vmatprep.subr.mxu0 %v866_v1 }
   0x3   :  { %13 = vsyncpa [#allocation3], 0  ;;  %748 = vmatprep.subr.mxu1 %v866_v1  ;;  %v32_v3 = vld [vmem:[%s1122_s1 + $0x8] sm:$0xff]  ;;  %772 = vmatprep.mubr.msk.f32.mxu0 %vm867_vm0, %v866_v1  ;;  %v31_v4 = vld [vmem:[%s1122_s1] sm:$0xff]  ;;  %vm40_vm1 = vcmask 261120   ;;  %vm198_vm2 = vcmask 130048  }
   0x4   :  { %749 = vmatpush3.msra.mxu1 %v33_v2  ;;  %v30_v5 = vld [vmem:[%s1121_s0] sm:$0xff]  ;;  %v117_v6 = vld [vmem:[%s1123_s2 + $0x18] sm:$0xff]  ;;  %v116_v7 = vld [vmem:[%s1123_s2 + $0x10] sm:$0xff]  ;;  %vm415_vm3 = vcmask 523264   ;;  %s868_s22 = smov 16   ;;  %vm447_vm4 = vcmask 392320  }
   0x5   :  { %750 = vmatprep.subr.mxu1 %v866_v1  ;;  %v115_v8 = vld [vmem:[%s1123_s2 + $0x8] sm:$0xff]  ;;  %v114_v9 = vld [vmem:[%s1123_s2] sm:$0xff]  ;;  %v334_v46 = vld [vmem:[%s1125_s4 + $0x18] sm:$0xff]  ;;  %s869_s27 = smov 48   ;;  %vm453_vm5 = vcmask 916864   ;;  %vm475_vm6 = vcmask 916480  }
   0x6   :  { %751 = vmatpush3.msra.mxu1 %v32_v3  ;;  %v688_v10 = vld [vmem:[%s1128_s7] ss:$0 sm:$0xff]  ;;  %v690_v14 = vld [vmem:[%s1128_s7 + $0x1] ss:$0 sm:$0xff]  ;;  %v225_v24 = vld [vmem:[%s1124_s3 + $0x8] sm:$0xff]  ;;  %s870_s29 = smov 96  }
   0x7   :  { %752 = vmatprep.subr.mxu1 %v866_v1  ;;  %v224_v25 = vld [vmem:[%s1124_s3] sm:$0xff]  ;;  %769 = vmatpush3.msra.mxu0 %v225_v24  ;;  %v333_v47 = vld [vmem:[%s1125_s4 + $0x10] sm:$0xff]  ;;  %v332_v48 = vld [vmem:[%s1125_s4 + $0x8] sm:$0xff]  ;;  %vm553_vm7 = vcmask 195584   ;;  %s871_s30 = smov 64   ;;  %vm558_vm8 = vcmask 991168  }
   0x8   :  { %753 = vmatpush3.msra.mxu1 %v31_v4  ;;  %770 = vmatprep.subr.mxu0 %v866_v1  ;;  %v692_v30 = vld [vmem:[%s1128_s7 + $0x2] ss:$0 sm:$0xff]  ;;  %v693_v32 = vld [vmem:[%s1128_s7 + $0x3] ss:$0 sm:$0xff]  ;;  %v694_v36 = vld [vmem:[%s1128_s7 + $0x4] ss:$0 sm:$0xff] }
   0x9   :  { %755 = vmatmul.mubr.msk.f32.vlgmr.msra.gmra.mxu1 %vm40_vm1, %v30_v5  ;;  %757 = vmatprep.subr.mxu1 %v866_v1  ;;  %v331_v49 = vld [vmem:[%s1125_s4] sm:$0xff]  ;;  %s872_s19 = smov 112   ;;  %s873_s20 = smov [#allocation2]   ;;  %vm672_vm9 = vcmask 982912  }
   0xa   :  { %758 = vmatpush3.msra.mxu1 %v117_v6  ;;  %765 = vmatprep.mubr.msk.f32.mxu1 %vm867_vm0, %v866_v1  ;;  %v696_v54 = vld [vmem:[%s1128_s7 + $0x5] ss:$0 sm:$0xff]  ;;  %v697_v56 = vld [vmem:[%s1128_s7 + $0x6] ss:$0 sm:$0xff]  ;;  %v698_v60 = vld [vmem:[%s1128_s7 + $0x7] ss:$0 sm:$0xff] }
   0xb   :  { %759 = vmatprep.subr.mxu1 %v866_v1  ;;  %771 = vmatpush3.msra.mxu0 %v224_v25  ;;  %v700_v25 = vld [vmem:[%s1128_s7 + $0x8] ss:$0 sm:$0xff]  ;;  %s680_s4 = sshll.u32 %s873_s20, 4  ;;  %s681_s4 = int_to_ptr.vmem [resolvable:$true] %s680_s4 }
   0xc   :  { %760 = vmatpush3.msra.mxu1 %v116_v7  ;;  %786 = vmatprep.subr.mxu0 %v866_v1  ;;  %s844_s21 = scalar_lea.vmem %s681_s4, 256  ;;  %p849_p1 = scmp.lt.s32.totalorder %s681_s4, %s681_s4 }
   0xd   :  { %761 = vmatprep.subr.mxu1 %v866_v1  ;;  %p845_p0 = scmp.ne.s32.totalorder %s681_s4, %s844_s21  ;;  %p850_p2 = scmp.lt.s32.totalorder %s844_s21, %s844_s21 }
   0xe   :  { %762 = vmatpush3.msra.mxu1 %v115_v8  ;;  %v469_v8 = vld [vmem:[%s1126_s5 + $0x68] sm:$0xff] }
   0xf   :  { %763 = vmatprep.subr.mxu1 %v866_v1  ;;  %p851_p3 = por %p850_p2, %p849_p1 }
  0x10   :  { %764 = vmatpush3.msra.mxu1 %v114_v9  ;;  %v468_v9 = vld [vmem:[%s1126_s5 + $0x60] sm:$0xff] }
  0x11   :  { %775 = vmatprep.subr.mxu1 %v866_v1  ;;  %p852_p4 = pnand %p851_p3, %p845_p0 }
  0xc9   :  { %v110_v11 = vpop.f32.mrf.mxu1 }
  0xca   :  { %v111_v12 = vadd.f32 %v688_v10, %v110_v11  ;;  %v467_v10 = vld [vmem:[%s1126_s5 + $0x58] sm:$0xff]  ;;  %v466_v11 = vld [vmem:[%s1126_s5 + $0x50] sm:$0xff] }
  0xcb   :  { %v756_v13 = vpop.f32.mrf.mxu1 }
  0xcc   :  { %766 = vmatmul.mubr.msk.f32.vlgmr.msra.gmra.mxu1 %vm40_vm1, %v111_v12  ;;  %v465_v12 = vld [vmem:[%s1126_s5 + $0x48] sm:$0xff]  ;;  %v464_v13 = vld [vmem:[%s1126_s5 + $0x40] sm:$0xff] }
  0xcd   :  { %783 = vmatprep.mubr.msk.f32.mxu1 %vm867_vm0, %v866_v1  ;;  %776 = vmatpush3.msra.mxu1 %v334_v46  ;;  %v588_v46 = vld [vmem:[%s1127_s6 + $0x10] sm:$0xff] }
  0xce   :  { %777 = vmatprep.subr.mxu1 %v866_v1 }
  0xcf   :  { %778 = vmatpush3.msra.mxu1 %v333_v47  ;;  %v587_v47 = vld [vmem:[%s1127_s6 + $0x8] sm:$0xff] }
  0xd0   :  { %779 = vmatprep.subr.mxu1 %v866_v1 }
  0xd1   :  { %780 = vmatpush3.msra.mxu1 %v332_v48  ;;  %v586_v48 = vld [vmem:[%s1127_s6] sm:$0xff] }
  0xd2   :  { %781 = vmatprep.subr.mxu1 %v866_v1 }
  0xd3   :  { %782 = vmatpush3.msra.mxu1 %v331_v49 }
  0xd4   :  { %817 = vmatprep.subr.mxu1 %v866_v1 }
 0x18c   :  { %v192_v15 = vpop.f32.mrf.mxu1 }
 0x18d   :  { %v193_v16 = vadd.f32 %v690_v14, %v192_v15  ;;  %v463_v14 = vld [vmem:[%s1126_s5 + $0x38] sm:$0xff]  ;;  %v462_v15 = vld [vmem:[%s1126_s5 + $0x30] sm:$0xff] }
 0x18e   :  { %v767_v17 = vpop.f32.mrf.mxu1 }
 0x18f   :  { %v199_v18 = vsel %vm198_vm2, %v193_v16, 0.0  ;;  %v460_v17 = vld [vmem:[%s1126_s5 + $0x20] sm:$0xff] }
 0x190   :  { %200 = vadd.xlane.f32.xlu0 %v199_v18 }
 0x219   :  { %v201_v19 = vpop.xlane.xlu0 %200 }
 0x21a   :  { %v203_v20 = vmul.f32 0.0625, %v201_v19 }
 0x21c   :  { %v204_v21 = vsub.f32 %v193_v16, %v203_v20  ;;  %v461_v16 = vld [vmem:[%s1126_s5 + $0x28] sm:$0xff] }
 0x21e   :  { %v205_v22 = vmul.f32 %v204_v21, %v204_v21 }
 0x220   :  { %v206_v23 = vsel %vm198_vm2, %v205_v22, 0.0  ;;  %v458_v22 = vld [vmem:[%s1126_s5 + $0x10] sm:$0xff] }
 0x221   :  { %207 = vadd.xlane.f32.xlu0 %v206_v23  ;;  %v457_v23 = vld [vmem:[%s1126_s5 + $0x8] sm:$0xff] }
 0x2aa   :  { %v208_v26 = vpop.xlane.xlu0 %207 }
 0x2ab   :  { %v209_v27 = vmul.f32 0.0625, %v208_v26  ;;  %v456_v26 = vld [vmem:[%s1126_s5] sm:$0xff] }
 0x2ad   :  { %v210_v28 = vadd.f32 1e-05, %v209_v27 }
 0x2af   :  { %836 = vrsqrt.f32 %v210_v28  ;;  %v701_v28 = vld [vmem:[%s1128_s7 + $0x9] ss:$0 sm:$0xff] }
 0x2bc   :  { %v837_v29 = vpop.eup %836 }
 0x2bd   :  { %v212_v31 = vmul.f32 %v837_v29, %v204_v21  ;;  %v459_v21 = vld [vmem:[%s1126_s5 + $0x18] sm:$0xff] }
 0x2bf   :  { %v217_v33 = vmul.f32 %v692_v30, %v212_v31 }
 0x2c1   :  { %v222_v34 = vadd.f32 %v693_v32, %v217_v33 }
 0x2c3   :  { %v223_v35 = vmax.f32 %v222_v34, 0.0  ;;  %v702_v34 = vld [vmem:[%s1128_s7 + $0xa] ss:$0 sm:$0xff] }
 0x2c5   :  { %773 = vmatmul.mubr.msk.f32.vlgmr.msra.gmra.mxu0 %vm198_vm2, %v223_v35  ;;  %443 = vst.msk [vmem:[#allocation2] sm:$0xff] %vm198_vm2, %v223_v35 }
 0x2c6   :  { %814 = vmatprep.mubr.msk.f32.mxu0 %vm867_vm0, %v866_v1  ;;  %787 = vmatpush3.msra.mxu0 %v469_v8 }
 0x2c7   :  { %788 = vmatprep.subr.mxu0 %v866_v1 }
 0x2c8   :  { %789 = vmatpush3.msra.mxu0 %v468_v9 }
 0x2c9   :  { %790 = vmatprep.subr.mxu0 %v866_v1 }
 0x2ca   :  { %791 = vmatpush3.msra.mxu0 %v467_v10 }
 0x2cb   :  { %792 = vmatprep.subr.mxu0 %v866_v1 }
 0x2cc   :  { %793 = vmatpush3.msra.mxu0 %v466_v11 }
 0x2cd   :  { %794 = vmatprep.subr.mxu0 %v866_v1 }
 0x2ce   :  { %795 = vmatpush3.msra.mxu0 %v465_v12 }
 0x2cf   :  { %796 = vmatprep.subr.mxu0 %v866_v1 }
 0x2d0   :  { %797 = vmatpush3.msra.mxu0 %v464_v13 }
 0x2d1   :  { %798 = vmatprep.subr.mxu0 %v866_v1 }
 0x2d2   :  { %799 = vmatpush3.msra.mxu0 %v463_v14 }
 0x2d3   :  { %800 = vmatprep.subr.mxu0 %v866_v1 }
 0x2d4   :  { %801 = vmatpush3.msra.mxu0 %v462_v15 }
 0x2d5   :  { %802 = vmatprep.subr.mxu0 %v866_v1 }
 0x2d6   :  { %803 = vmatpush3.msra.mxu0 %v461_v16 }
 0x2d7   :  { %804 = vmatprep.subr.mxu0 %v866_v1 }
 0x2d8   :  { %805 = vmatpush3.msra.mxu0 %v460_v17 }
 0x2d9   :  { %806 = vmatprep.subr.mxu0 %v866_v1 }
 0x2da   :  { %807 = vmatpush3.msra.mxu0 %v459_v21 }
 0x2db   :  { %808 = vmatprep.subr.mxu0 %v866_v1 }
 0x2dc   :  { %809 = vmatpush3.msra.mxu0 %v458_v22 }
 0x2dd   :  { %810 = vmatprep.subr.mxu0 %v866_v1 }
 0x2de   :  { %811 = vmatpush3.msra.mxu0 %v457_v23 }
 0x2df   :  { %812 = vmatprep.subr.mxu0 %v866_v1 }
 0x2e0   :  { %813 = vmatpush3.msra.mxu0 %v456_v26 }
 0x385   :  { %v300_v37 = vpop.f32.mrf.mxu0 }
 0x386   :  { %v301_v38 = vadd.f32 %v694_v36, %v300_v37 }
 0x387   :  { %v774_v39 = vpop.f32.mrf.mxu0 }
 0x388   :  { %v306_v40 = vsel %vm40_vm1, %v301_v38, 0.0 }
 0x389   :  { %307 = vadd.xlane.f32.xlu1 %v306_v40 }
 0x412   :  { %v308_v41 = vpop.xlane.xlu1 %307 }
 0x413   :  { %v310_v42 = vmul.f32 0.03125, %v308_v41 }
 0x415   :  { %v311_v43 = vsub.f32 %v301_v38, %v310_v42 }
 0x417   :  { %v312_v44 = vmul.f32 %v311_v43, %v311_v43 }
 0x419   :  { %v313_v45 = vsel %vm40_vm1, %v312_v44, 0.0 }
 0x41a   :  { %314 = vadd.xlane.f32.xlu1 %v313_v45  ;;  %v589_v45 = vld [vmem:[%s1127_s6 + $0x18] sm:$0xff] }
 0x4a3   :  { %v315_v50 = vpop.xlane.xlu1 %314 }
 0x4a4   :  { %v316_v51 = vmul.f32 0.03125, %v315_v50 }
 0x4a6   :  { %v317_v52 = vadd.f32 1e-05, %v316_v51 }
 0x4a8   :  { %838 = vrsqrt.f32 %v317_v52 }
 0x4b5   :  { %v839_v53 = vpop.eup %838 }
 0x4b6   :  { %v319_v55 = vmul.f32 %v839_v53, %v311_v43 }
 0x4b8   :  { %v324_v57 = vmul.f32 %v696_v54, %v319_v55  ;;  %v704_v54 = vld [vmem:[%s1128_s7 + $0xb] ss:$0 sm:$0xff] }
 0x4ba   :  { %v329_v58 = vadd.f32 %v697_v56, %v324_v57  ;;  %v705_v56 = vld [vmem:[%s1128_s7 + $0xc] ss:$0 sm:$0xff] }
 0x4bc   :  { %v330_v59 = vmax.f32 %v329_v58, 0.0 }
 0x4be   :  { %784 = vmatmul.mubr.msk.f32.vlgmr.msra.gmra.mxu1 %vm40_vm1, %v330_v59 }
 0x4bf   :  { %825 = vmatprep.mubr.msk.f32.mxu1 %vm867_vm0, %v866_v1  ;;  %818 = vmatpush3.msra.mxu1 %v589_v45 }
 0x4c0   :  { %819 = vmatprep.subr.mxu1 %v866_v1 }
 0x4c1   :  { %820 = vmatpush3.msra.mxu1 %v588_v46 }
 0x4c2   :  { %821 = vmatprep.subr.mxu1 %v866_v1 }
 0x4c3   :  { %822 = vmatpush3.msra.mxu1 %v587_v47 }
 0x4c4   :  { %823 = vmatprep.subr.mxu1 %v866_v1 }
 0x4c5   :  { %824 = vmatpush3.msra.mxu1 %v586_v48 }
 0x57e   :  { %v409_v61 = vpop.f32.mrf.mxu1 }
 0x57f   :  { %v410_v62 = vadd.f32 %v698_v60, %v409_v61 }
 0x580   :  { %v785_v63 = vpop.f32.mrf.mxu1 }
 0x581   :  { %v416_v0 = vsel %vm415_vm3, %v410_v62, 0.0 }
 0x582   :  { %417 = vadd.xlane.f32.xlu0 %v416_v0 }
 0x598   :  { %444 = vrot.lane.b32.xlu0 %v330_v59, %s868_s22  ;;  %v706_v59 = vld [vmem:[%s1128_s7 + $0xd] ss:$0 sm:$0xff] }
 0x60b   :  { %v418_v2 = vpop.xlane.xlu0 %417 }
 0x60c   :  { %v420_v3 = vmul.f32 0.015625, %v418_v2 }
 0x60e   :  { %v421_v4 = vsub.f32 %v410_v62, %v420_v3 }
 0x60f   :  { %v445_v5 = vpop.permute.xlu0 %444 }
 0x610   :  { %448 = vst.msk [vmem:[#allocation2] sm:$0xff] %vm447_vm4, %v445_v5  ;;  %v422_v6 = vmul.f32 %v421_v4, %v421_v4 }
 0x612   :  { %v423_v7 = vsel %vm415_vm3, %v422_v6, 0.0 }
 0x613   :  { %424 = vadd.xlane.f32.xlu1 %v423_v7 }
 0x69c   :  { %v425_v18 = vpop.xlane.xlu1 %424 }
 0x69d   :  { %v426_v19 = vmul.f32 0.015625, %v425_v18 }
 0x69f   :  { %v427_v20 = vadd.f32 1e-05, %v426_v19 }
 0x6a1   :  { %840 = vrsqrt.f32 %v427_v20 }
 0x6ae   :  { %v841_v24 = vpop.eup %840 }
 0x6af   :  { %v429_v27 = vmul.f32 %v841_v24, %v421_v4 }
 0x6b1   :  { %v434_v29 = vmul.f32 %v700_v25, %v429_v27 }
 0x6b3   :  { %v439_v30 = vadd.f32 %v701_v28, %v434_v29 }
 0x6b5   :  { %v440_v31 = vmax.f32 %v439_v30, 0.0 }
 0x6b7   :  { %450 = vrot.lane.b32.xlu1 %v440_v31, %s869_s27 }
 0x729   :  { %v451_v32 = vpop.permute.xlu1 %450 }
 0x72a   :  { %454 = vst.msk [vmem:[#allocation2] sm:$0xff] %vm453_vm5, %v451_v32 }
 0x731   :  { %v455_v33 = vld [vmem:[#allocation2] sm:$0xff] }
 0x732   :  { %815 = vmatmul.mubr.msk.f32.vlgmr.msra.gmra.mxu0 %vm475_vm6, %v455_v33 }
 0x7f2   :  { %v545_v35 = vpop.f32.mrf.mxu0 }
 0x7f3   :  { %v546_v36 = vadd.f32 %v702_v34, %v545_v35 }
 0x7f4   :  { %v816_v37 = vpop.f32.mrf.mxu0 }
 0x7f5   :  { %v562_v38 = vsel %vm40_vm1, %v546_v36, 0.0 }
 0x7f6   :  { %563 = vadd.xlane.f32.xlu1 %v562_v38 }
 0x807   :  { %550 = vrot.lane.b32.xlu1 %v546_v36, %s870_s29 }
 0x87f   :  { %v564_v39 = vpop.xlane.xlu1 %563 }
 0x880   :  { %v565_v40 = vmul.f32 0.03125, %v564_v39 }
 0x882   :  { %v566_v41 = vsub.f32 %v546_v36, %v565_v40 }
 0x883   :  { %v551_v42 = vpop.permute.xlu1 %550 }
 0x884   :  { %554 = vst.msk [vmem:[#allocation2 + $0x8] sm:$0xff] %vm553_vm7, %v551_v42  ;;  %v567_v43 = vmul.f32 %v566_v41, %v566_v41 }
 0x886   :  { %v568_v44 = vsel %vm40_vm1, %v567_v43, 0.0 }
 0x887   :  { %569 = vadd.xlane.f32.xlu0 %v568_v44 }
 0x89d   :  { %555 = vrot.lane.b32.xlu0 %v546_v36, %s871_s30 }
 0x910   :  { %v570_v49 = vpop.xlane.xlu0 %569 }
 0x911   :  { %v571_v50 = vmul.f32 0.03125, %v570_v49 }
 0x913   :  { %v572_v51 = vadd.f32 1e-05, %v571_v50 }
 0x914   :  { %v556_v52 = vpop.permute.xlu0 %555 }
 0x915   :  { %842 = vrsqrt.f32 %v572_v51  ;;  %559 = vst.msk [vmem:[#allocation2] sm:$0xff] %vm558_vm8, %v556_v52 }
 0x922   :  { %v843_v53 = vpop.eup %842 }
 0x923   :  { %v574_v55 = vmul.f32 %v843_v53, %v566_v41 }
 0x925   :  { %v579_v57 = vmul.f32 %v704_v54, %v574_v55 }
 0x927   :  { %v584_v1 = vadd.f32 %v705_v56, %v579_v57 }
 0x929   :  { %v585_v58 = vmax.f32 %v584_v1, 0.0 }
 0x92b   :  { %826 = vmatmul.mubr.msk.f32.vlgmr.msra.gmra.mxu1 %vm40_vm1, %v585_v58 }
 0x9eb   :  { %v664_v60 = vpop.f32.mrf.mxu1 }
 0x9ec   :  { %v665_v61 = vadd.f32 %v706_v59, %v664_v60 }
 0x9ed   :  { %v827_v62 = vpop.f32.mrf.mxu1 }
 0x9ee   :  { %669 = vrot.lane.b32.xlu1 %v665_v61, %s872_s19 }
 0xa60   :  { %v670_v63 = vpop.permute.xlu1 %669 }
 0xa61   :  { %673 = vst.msk [vmem:[#allocation2] sm:$0xff] %vm672_vm9, %v670_v63 }
 0xa62   :  { %855 = shalt.err (!%p852_p4)
}
 0xa63   :  { %683 = dma.vmem_to_hbm [thread:$0]  %s681_s4, 256, %s1129_s8, [#allocation3]  }
 0xa64   :  { %864 = dma.done.wait [#allocation3], 256  }
 0xa65   :  { %865 = vsyncadd [#allocation3], 4294967040 }
 0xa66   :  { %687 = vsyncpa [#allocation3], 1 }

</bundles_post_ra>
